<compile_context>
chip_gen: v7x
topology: tpu7x:2x2x1
jax: 0.10.0
libtpu: 0.0.40
codegen_flags: <defaults>
</compile_context>

<pallas_src>
import functools

import jax
import jax.numpy as jnp
from jax.experimental import pallas as pl
from jax.experimental.pallas import tpu as pltpu


def _step_math(x, threshold_value, min_value, max_value):
    """Folded Step math evaluated in x.dtype (shared by kernel body & fallback)."""
    dtype = x.dtype
    t = jnp.asarray(threshold_value, dtype)
    hi = jnp.asarray(max_value, dtype)
    neg_min = -jnp.asarray(min_value, dtype)
    # Value taken whenever NOT (x > t); constant-folded at trace time.
    else_c = jnp.where(neg_min > -t, neg_min, hi)
    return jnp.where(x > t, hi, else_c)


def _make_step_kernel(threshold_value, min_value, max_value):
    def step_kernel(x_ref, o_ref):
        o_ref[...] = _step_math(x_ref[...], threshold_value, min_value, max_value)
    return step_kernel


def _round_up(v, m):
    return ((v + m - 1) // m) * m


def _default_tile_bytes():
    # ~4 MiB blocks reach ~85-90% of HBM roofline on v5e/v6e; on v7x-class
    # parts (64 MiB VMEM, 3.2 TB/s HBM) 8 MiB blocks recover more of the
    # ~0.35 us per-grid-step overhead.
    try:
        vmem = pltpu.get_tpu_info().vmem_capacity_bytes
        if vmem is not None and int(vmem) <= (64 << 20):
            return 8 << 20
    except Exception:
        pass
    return 4 << 20


_DEFAULT_TILE_BYTES = _default_tile_bytes()


def _choose_blocking(rows, row_bytes, sublane_min, tile_bytes):
    """Pick (block_rows, grid_len).

    Big blocks for streaming efficiency, but never a single-step grid once the
    array passes ~1 MiB (a 1-step grid has zero DMA/compute overlap and pins
    all work on one v7x TensorCore)."""
    total_bytes = rows * row_bytes
    budget_rows = max(sublane_min,
                      (tile_bytes // row_bytes) // sublane_min * sublane_min)
    if total_bytes <= (1 << 20) and rows <= budget_rows:
        return rows, 1                      # tiny: one full-extent block
    # >= 2 steps so input DMA of step i+1 overlaps output DMA of step i.
    block_rows = min(budget_rows, _round_up(pl.cdiv(rows, 2), sublane_min))
    grid_len = pl.cdiv(rows, block_rows)
    if grid_len > 1 and grid_len % 2:
        # Prefer an even step count so both v7x TensorCores get equal work.
        alt_rows = max(sublane_min,
                       _round_up(pl.cdiv(rows, grid_len + 1), sublane_min))
        alt_grid = pl.cdiv(rows, alt_rows)
        if alt_grid % 2 == 0:
            block_rows, grid_len = alt_rows, alt_grid
    return block_rows, grid_len


@functools.partial(jax.jit, static_argnums=(1, 2, 3, 4, 5, 6))
def _step_forward_impl(x, threshold_value, min_value, max_value,
                       tile_bytes, small_bypass_bytes, donate_input):
    orig_shape = x.shape
    dtype = x.dtype
    n = int(x.size)
    dtype_bytes = jnp.dtype(dtype).itemsize

    # Small-input bypass: a fused XLA elementwise op beats kernel-launch +
    # per-grid-step overhead for KB-scale activations.
    if n * dtype_bytes <= small_bypass_bytes or n < 128:
        return _step_math(x, threshold_value, min_value, max_value)

    # Keep the 4-buffer pipeline footprint comfortably under 48 MiB (v7x safe).
    tile_bytes = min(int(tile_bytes), 8 << 20)
    sublane_min = {4: 8, 2: 16, 1: 32}.get(dtype_bytes, 8)

    # Widest lane-dense width in {1024,512,256,128} that divides n (no copy);
    # otherwise lane=128 and the <128-element tail is handled outside the kernel.
    lane = None
    for cand in (1024, 512, 256, 128):
        if n % cand == 0:
            lane = cand
            break
    if lane is None:
        lane = 128
    n_main = (n // lane) * lane
    n_tail = n - n_main                      # 0 if aligned, else < 128

    x_flat = jnp.ravel(x)
    x_main = x_flat[:n_main] if n_tail else x_flat
    rows = n_main // lane
    x2d = x_main.reshape(rows, lane)

    block_rows, grid_len = _choose_blocking(rows, lane * dtype_bytes,
                                            sublane_min, tile_bytes)
    block_bytes = block_rows * lane * dtype_bytes
    # 2 buffers x (in + out) x block + margin: explicit so it never collides
    # with the scoped-VMEM defaults (16 MiB on v5e), capped well under v7x's
    # 64 MiB physical VMEM.
    vmem_limit = int(min(max(4 * block_bytes + (2 << 20), 16 << 20), 48 << 20))

    kernel = _make_step_kernel(threshold_value, min_value, max_value)
    cost = pl.CostEstimate(flops=n_main, transcendentals=0,
                           bytes_accessed=2 * n_main * dtype_bytes)

    out2d = pl.pallas_call(
        kernel,
        out_shape=jax.ShapeDtypeStruct((rows, lane), dtype),
        grid_spec=pltpu.PrefetchScalarGridSpec(
            num_scalar_prefetch=0,
            grid=(grid_len,),
            in_specs=[pl.BlockSpec((block_rows, lane), lambda i: (i, 0))],
            out_specs=pl.BlockSpec((block_rows, lane), lambda i: (i, 0)),
        ),
        compiler_params=pltpu.CompilerParams(
            dimension_semantics=("parallel",),
            vmem_limit_bytes=vmem_limit),
        cost_estimate=cost,
        input_output_aliases={0: 0} if donate_input else {},
    )(x2d)

    out_flat = out2d.reshape(-1)
    if n_tail:
        tail_out = _step_math(x_flat[n_main:], threshold_value,
                              min_value, max_value)
        out_flat = jnp.concatenate([out_flat, tail_out])
    return out_flat.reshape(orig_shape)


def step_forward(x, threshold_value=0, min_value=0, max_value=1, *,
                 tile_bytes=None, small_bypass_bytes=256 * 1024,
                 donate_input=False):
    """Step module forward pass for an arbitrary-shaped float array."""
    if tile_bytes is None:
        tile_bytes = _DEFAULT_TILE_BYTES
    return _step_forward_impl(x, float(threshold_value), float(min_value),
                              float(max_value), int(tile_bytes),
                              int(small_bypass_bytes), bool(donate_input))


def step_reference(x, threshold_value=0, min_value=0, max_value=1):
    """Plain-JAX reference, literal PyTorch nn.Threshold composition."""
    y1 = jnp.where(x > threshold_value, x, jnp.asarray(min_value, x.dtype))
    y2 = -y1
    return jnp.where(y2 > -threshold_value, y2,
                     jnp.asarray(max_value, x.dtype))


if __name__ == "__main__":
    key = jax.random.PRNGKey(0)

    # Small NCHW input consistent with a conv-style pipeline.
    x = jax.random.normal(key, (2, 4, 16, 16), dtype=jnp.float32)

    # 1) Default params, forced through the Pallas kernel path.
    out = jax.block_until_ready(step_forward(x, 0, 0, 1, small_bypass_bytes=0))
    ref = step_reference(x, 0, 0, 1)
    assert jnp.array_equal(out, ref), "mismatch (default params, kernel path)"

    # 2) Non-default params via the small-input fused-XLA bypass (default cutoff).
    out2 = jax.block_until_ready(step_forward(x, 0.5, -2.0, 3.0))
    ref2 = step_reference(x, 0.5, -2.0, 3.0)
    assert jnp.array_equal(out2, ref2), "mismatch (custom params, bypass path)"

    # 3) Misaligned size -> aligned-prefix kernel + jnp tail (no pad/slice copies).
    key, k1 = jax.random.split(key)
    x_odd = jax.random.normal(k1, (3, 5, 7, 11), dtype=jnp.float32)
    out3 = jax.block_until_ready(
        step_forward(x_odd, 0.25, -1.0, 2.0, small_bypass_bytes=0))
    ref3 = step_reference(x_odd, 0.25, -1.0, 2.0)
    assert jnp.array_equal(out3, ref3), "mismatch (odd shape, split tail)"

    # 4) Larger input, small tile budget -> multi-step even grid + aliased output.
    key, k2 = jax.random.split(key)
    x_big = jax.random.normal(k2, (2, 4, 64, 128), dtype=jnp.float32)
    ref4 = step_reference(x_big, 0.1, -0.5, 1.5)
    out4 = jax.block_until_ready(
        step_forward(x_big, 0.1, -0.5, 1.5, tile_bytes=64 * 1024,
                     small_bypass_bytes=0, donate_input=True))
    assert jnp.array_equal(out4, ref4), "mismatch (tiled grid)"

    # 5) bf16 path (dtype-aware sublane minimum), kernel path.
    x_bf16 = x.astype(jnp.bfloat16)
    out5 = jax.block_until_ready(
        step_forward(x_bf16, 0.5, -2.0, 3.0, small_bypass_bytes=0))
    ref5 = step_reference(x_bf16, 0.5, -2.0, 3.0)
    assert jnp.array_equal(out5, ref5), "mismatch (bf16)"

    print("KERNEL_OK")
</pallas_src>

<mosaic_0001>
module attributes {stable_mosaic.version = 11 : i64} {
  func.func @step_kernel(%arg0: i32, %arg1: memref<2x1024xf32, #tpu.memory_space<vmem>>, %arg2: memref<2x1024xf32, #tpu.memory_space<vmem>>) attributes {dimension_semantics = [#tpu.dimension_semantics<parallel>], iteration_bounds = array<i64: 1>, scalar_prefetch = 0 : i64, scratch_operands = 0 : i64, tpu.core_type = #tpu.core_type<tc>, window_params = [{transform_indices = @transform_0, window_bounds = array<i64: 2, 1024>}, {transform_indices = @transform_1, window_bounds = array<i64: 2, 1024>}]} {
    %c0 = arith.constant 0 : index
    %c0_0 = arith.constant 0 : index
    %0 = vector.load %arg1[%c0, %c0_0] : memref<2x1024xf32, #tpu.memory_space<vmem>>, vector<2x1024xf32>
    %cst = arith.constant 0.000000e+00 : f32
    %cst_1 = arith.constant 0.000000e+00 : f32
    %1 = arith.subf %cst, %cst_1 : f32
    %cst_2 = arith.constant 0.000000e+00 : f32
    %cst_3 = arith.constant 0.000000e+00 : f32
    %2 = arith.subf %cst_2, %cst_3 : f32
    %3 = arith.cmpf ogt, %1, %2 : f32
    %cst_4 = arith.constant 1.000000e+00 : f32
    %4 = arith.select %3, %1, %cst_4 : f32
    %cst_5 = arith.constant 0.000000e+00 : f32
    %5 = vector.broadcast %cst_5 : f32 to vector<2x1024xf32>
    %6 = arith.cmpf ogt, %0, %5 : vector<2x1024xf32>
    %cst_6 = arith.constant 1.000000e+00 : f32
    %7 = vector.broadcast %cst_6 : f32 to vector<2x1024xf32>
    %8 = vector.broadcast %4 : f32 to vector<2x1024xf32>
    %9 = arith.select %6, %7, %8 : vector<2x1024xi1>, vector<2x1024xf32>
    %c0_7 = arith.constant 0 : index
    %c0_8 = arith.constant 0 : index
    %10 = vector.load %arg2[%c0_7, %c0_8] : memref<2x1024xf32, #tpu.memory_space<vmem>>, vector<2x1024xf32>
    tpu.vector_store %arg2[%c0_7, %c0_8], %9 {strides = array<i32>} : memref<2x1024xf32, #tpu.memory_space<vmem>>, vector<2x1024xf32>,
    return
  }
  func.func @transform_0(%arg0: i32) -> (i32, i32) {
    %c0_i32 = arith.constant 0 : i32
    %c0_i32_0 = arith.constant 0 : i32
    return %arg0, %c0_i32 : i32, i32
  }
  func.func @transform_1(%arg0: i32) -> (i32, i32) {
    %c0_i32 = arith.constant 0 : i32
    %c0_i32_0 = arith.constant 0 : i32
    return %arg0, %c0_i32 : i32, i32
  }
}

</mosaic_0001>

<bundles_post_ra>
// kernel: _step_forward_impl.1
= control target key start
LH: loop header
LB: loop body
LE: loop exit
PB: predicated region body
PF: predicated region fallthrough
CT: control target
= control target key end

     0   :  { %v15_v0 = vmov 1.0   ;;  %s32_s0 = inlined_call_operand.vmem [shape: f32[2,1024], index: 0, kind: input, shape index: {}]   ;;  %s33_s1 = inlined_call_operand.vmem [shape: f32[2,1024], index: 1, kind: output, shape index: {}]  }
   0x1   :  { %8 = vst [vmem:[%s33_s1] sm:$0xff] %v15_v0  ;;  %9 = vst [vmem:[%s33_s1 + $0x8] sm:$0xff] %v15_v0 }

</bundles_post_ra>
